<compile_context>
chip_gen: v7x
topology: tpu7x:2x2x1
jax: 0.10.0
libtpu: 0.0.40
codegen_flags: <defaults>
</compile_context>

<pallas_src>
import functools

import jax
import jax.numpy as jnp
from jax.experimental import pallas as pl
from jax.experimental.pallas import tpu as pltpu

LANES = 128
SUBLANES = 8
# Single un-pipelined block for anything up to this many (row, 128) rows
# (8192 rows * 128 lanes * 4 B = 4 MiB per input resident in VMEM).
SINGLE_MAX_ROWS = 8192
# Tiled path: 8192 rows -> 4 MiB per operand per grid step; 2 operands x
# 2 pipeline buffers = 16 MiB of input buffers.
BLOCK_ROWS = 8192
# Leading "parallel" grid axis: sharded across the 2 TensorCores on v7x,
# plain serial (and essentially free) on single-TC v5e/v6e.
NUM_CORE_SPLIT = 2
VMEM_LIMIT_BYTES = 64 * 1024 * 1024


def _charbonnier_single_kernel(o_ref, g_ref, out_ref, *, eps2):
    # Whole problem in one block: elementwise + full reduce, raw sum out.
    d = o_ref[...].astype(jnp.float32) - g_ref[...].astype(jnp.float32)
    out_ref[...] = jnp.sum(jnp.sqrt(d * d + eps2), keepdims=True)


def _charbonnier_tiled_kernel(o_ref, g_ref, out_ref, acc_ref, *,
                              eps2, rows_total, blocks_per_core, need_mask):
    c = pl.program_id(0)   # core-split axis ("parallel")
    i = pl.program_id(1)   # reduction axis ("arbitrary")

    @pl.when(i == 0)
    def _():
        acc_ref[...] = jnp.zeros_like(acc_ref)

    d = o_ref[...].astype(jnp.float32) - g_ref[...].astype(jnp.float32)
    v = jnp.sqrt(d * d + eps2)

    if need_mask:
        # Global row index of every element in this tile; rows >= rows_total
        # come from the (clamped / partial) edge block and contribute zero.
        g_block = c * blocks_per_core + i
        row = g_block * BLOCK_ROWS + jax.lax.broadcasted_iota(
            jnp.int32, v.shape, 0)
        v = jnp.where(row < rows_total, v, 0.0)

    # Fold the (BLOCK_ROWS, 128) tile onto an (8, 128) vreg accumulator with
    # VPU adds only; the expensive cross-sublane/lane XLU reduce happens
    # exactly once per core in the finalize step below.
    acc_ref[...] += jnp.sum(
        v.reshape(BLOCK_ROWS // SUBLANES, SUBLANES, LANES), axis=0)

    @pl.when(i == pl.num_programs(1) - 1)
    def _():
        out_ref[...] = jnp.sum(acc_ref[...], keepdims=True)


def charbonnier_loss(output, gt, epsilon=0.001):
    assert output.shape == gt.shape, "output/gt shape mismatch"
    total = int(output.size)
    eps2 = float(epsilon) ** 2            # compile-time Python scalar

    o_flat = output.reshape(-1)
    g_flat = gt.reshape(-1)

    # 128-aligned bulk goes through the Pallas kernel (reshape of the aligned
    # prefix is layout-free); the ragged tail (< 128 elems) is reduced with
    # plain jnp.  No padded copies of the inputs are ever made.
    rows = total // LANES
    bulk = rows * LANES
    tail = total - bulk

    acc_sum = jnp.zeros((), jnp.float32)
    if tail:
        dt = (o_flat[bulk:].astype(jnp.float32)
              - g_flat[bulk:].astype(jnp.float32))
        acc_sum = acc_sum + jnp.sum(jnp.sqrt(dt * dt + eps2))

    if rows > 0:
        if tail:
            o_bulk, g_bulk = o_flat[:bulk], g_flat[:bulk]
        else:
            o_bulk, g_bulk = o_flat, g_flat
        o2 = o_bulk.reshape(rows, LANES)
        g2 = g_bulk.reshape(rows, LANES)

        if rows <= SINGLE_MAX_ROWS:
            # One un-pipelined block: full-extent block shape, so no (8,128)
            # divisibility requirement and no masking needed.
            kernel = functools.partial(_charbonnier_single_kernel, eps2=eps2)
            s = pl.pallas_call(
                kernel,
                out_shape=jax.ShapeDtypeStruct((1, 1), jnp.float32),
                grid_spec=pltpu.PrefetchScalarGridSpec(
                    num_scalar_prefetch=0,
                    grid=(1,),
                    in_specs=[
                        pl.BlockSpec((rows, LANES), lambda i: (0, 0)),
                        pl.BlockSpec((rows, LANES), lambda i: (0, 0)),
                    ],
                    out_specs=pl.BlockSpec((1, 1), lambda i: (0, 0)),
                ),
                compiler_params=pltpu.CompilerParams(
                    dimension_semantics=("arbitrary",),
                    vmem_limit_bytes=VMEM_LIMIT_BYTES),
            )(o2, g2)
            bulk_sum = s[0, 0]
        else:
            nblocks = -(-rows // BLOCK_ROWS)                 # cdiv
            bpc = -(-nblocks // NUM_CORE_SPLIT)              # blocks per core
            # Mask only if some block rows fall outside [0, rows).
            need_mask = (NUM_CORE_SPLIT * bpc * BLOCK_ROWS != rows)

            def in_map(c, i, _nb=nblocks, _bpc=bpc):
                # Clamp so the DMA for any "extra" block on core 1 stays in
                # bounds; its contribution is zeroed by the in-kernel mask.
                return (jnp.minimum(c * _bpc + i, _nb - 1), 0)

            kernel = functools.partial(
                _charbonnier_tiled_kernel, eps2=eps2, rows_total=rows,
                blocks_per_core=bpc, need_mask=need_mask)
            s = pl.pallas_call(
                kernel,
                out_shape=jax.ShapeDtypeStruct((NUM_CORE_SPLIT, 1),
                                               jnp.float32),
                grid_spec=pltpu.PrefetchScalarGridSpec(
                    num_scalar_prefetch=0,
                    grid=(NUM_CORE_SPLIT, bpc),
                    in_specs=[
                        pl.BlockSpec((BLOCK_ROWS, LANES), in_map),
                        pl.BlockSpec((BLOCK_ROWS, LANES), in_map),
                    ],
                    out_specs=pl.BlockSpec((1, 1), lambda c, i: (c, 0)),
                    scratch_shapes=[
                        pltpu.VMEM((SUBLANES, LANES), jnp.float32)],
                ),
                compiler_params=pltpu.CompilerParams(
                    dimension_semantics=("parallel", "arbitrary"),
                    vmem_limit_bytes=VMEM_LIMIT_BYTES),
            )(o2, g2)
            # Per-core partial sums; reduce in the wrapper.
            bulk_sum = jnp.sum(s)
        acc_sum = acc_sum + bulk_sum

    # Single scalar mean division in the wrapper (kernels emit raw sums).
    return acc_sum / total


if __name__ == "__main__":
    key = jax.random.PRNGKey(0)
    k1, k2 = jax.random.split(key)
    # NCHW: batch=2, channels=4, spatial=16x16 (matches the PyTorch module usage)
    output = jax.random.normal(k1, (2, 4, 16, 16), dtype=jnp.float32)
    gt = jax.random.normal(k2, (2, 4, 16, 16), dtype=jnp.float32)

    loss = charbonnier_loss(output, gt, epsilon=0.001)
    loss = jax.block_until_ready(loss)

    # reference check (plain JAX, mirrors the torch forward)
    ref = jnp.mean(jnp.sqrt((output - gt) ** 2 + 0.001 ** 2))
    assert jnp.allclose(loss, ref, rtol=1e-5, atol=1e-6), (loss, ref)

    print("KERNEL_OK")
</pallas_src>

<mosaic_0001>
module attributes {stable_mosaic.version = 11 : i64} {
  func.func @_charbonnier_single_kernel(%arg0: i32, %arg1: memref<16x128xf32, #tpu.memory_space<vmem>>, %arg2: memref<16x128xf32, #tpu.memory_space<vmem>>, %arg3: memref<1x1xf32, #tpu.memory_space<vmem>>) attributes {dimension_semantics = [#tpu.dimension_semantics<arbitrary>], iteration_bounds = array<i64: 1>, scalar_prefetch = 0 : i64, scratch_operands = 0 : i64, tpu.core_type = #tpu.core_type<tc>, window_params = [{pipeline_mode = #tpu.pipeline_mode<synchronous>, transform_indices = @transform_0, window_bounds = array<i64: 16, 128>}, {pipeline_mode = #tpu.pipeline_mode<synchronous>, transform_indices = @transform_1, window_bounds = array<i64: 16, 128>}, {pipeline_mode = #tpu.pipeline_mode<synchronous>, transform_indices = @transform_2, window_bounds = array<i64: 1, 1>}]} {
    %c0 = arith.constant 0 : index
    %c0_0 = arith.constant 0 : index
    %0 = vector.load %arg1[%c0, %c0_0] : memref<16x128xf32, #tpu.memory_space<vmem>>, vector<16x128xf32>
    %c0_1 = arith.constant 0 : index
    %c0_2 = arith.constant 0 : index
    %1 = vector.load %arg2[%c0_1, %c0_2] : memref<16x128xf32, #tpu.memory_space<vmem>>, vector<16x128xf32>
    %2 = arith.subf %0, %1 : vector<16x128xf32>
    %3 = arith.mulf %2, %2 : vector<16x128xf32>
    %cst = arith.constant 9.99999997E-7 : f32
    %4 = vector.broadcast %cst : f32 to vector<16x128xf32>
    %5 = arith.addf %3, %4 : vector<16x128xf32>
    %6 = math.sqrt %5 : vector<16x128xf32>
    %7 = vector.shape_cast %6 : vector<16x128xf32> to vector<1x16x128xf32>
    %cst_3 = arith.constant dense<0.000000e+00> : vector<1xf32>
    %8 = vector.multi_reduction <add>, %7, %cst_3 [1, 2] : vector<1x16x128xf32> to vector<1xf32>
    %9 = vector.shape_cast %8 : vector<1xf32> to vector<1x1x1xf32>
    %10 = vector.extract %9[0, 0, 0] : f32 from vector<1x1x1xf32>
    %11 = vector.broadcast %10 : f32 to vector<1x1xf32>
    %c0_4 = arith.constant 0 : index
    %c0_5 = arith.constant 0 : index
    %12 = vector.load %arg3[%c0_4, %c0_5] : memref<1x1xf32, #tpu.memory_space<vmem>>, vector<1x1xf32>
    tpu.vector_store %arg3[%c0_4, %c0_5], %11 {strides = array<i32>} : memref<1x1xf32, #tpu.memory_space<vmem>>, vector<1x1xf32>,
    return
  }
  func.func @transform_0(%arg0: i32) -> (i32, i32) {
    %c0_i32 = arith.constant 0 : i32
    %c0_i32_0 = arith.constant 0 : i32
    %c0_i32_1 = arith.constant 0 : i32
    return %c0_i32, %c0_i32_0 : i32, i32
  }
  func.func @transform_1(%arg0: i32) -> (i32, i32) {
    %c0_i32 = arith.constant 0 : i32
    %c0_i32_0 = arith.constant 0 : i32
    %c0_i32_1 = arith.constant 0 : i32
    return %c0_i32, %c0_i32_0 : i32, i32
  }
  func.func @transform_2(%arg0: i32) -> (i32, i32) {
    %c0_i32 = arith.constant 0 : i32
    %c0_i32_0 = arith.constant 0 : i32
    %c0_i32_1 = arith.constant 0 : i32
    return %c0_i32, %c0_i32_0 : i32, i32
  }
}

</mosaic_0001>

<bundles_post_ra>
// kernel: tpu_custom_call.1
= control target key start
LH: loop header
LB: loop body
LE: loop exit
PB: predicated region body
PF: predicated region fallthrough
CT: control target
= control target key end

     0   :  { %7 = vsyncpa [#allocation3], 0  ;;  %s232_s0 = inlined_call_operand.hbm [shape: f32[16,128], index: 0, kind: input, shape index: {}]   ;;  %s233_s1 = inlined_call_operand.hbm [shape: f32[16,128], index: 1, kind: input, shape index: {}]   ;;  %s234_s2 = inlined_call_operand.hbm [shape: f32[1,1], index: 2, kind: output, shape index: {}]  }
   0x1   :  { %8 = vsyncpa [#allocation6], 0 }
   0x2   :  { %9 = vsyncpa [#allocation4], 0  ;;  %s176_s9 = smov [#allocation2]   ;;  %s104_s13 = scalar_lea.hbm %s232_s0, 256 }
   0x3   :  { %s15_s10 = sshll.u32 %s176_s9, 4  ;;  %p105_p0 = scmp.ne.s32.totalorder %s232_s0, %s104_s13  ;;  %s16_s10 = int_to_ptr.vmem [resolvable:$true] %s15_s10 }
   0x4   :  { %p108_p1 = scmp.lt.u32.totalorder %s104_s13, %s232_s0 }
   0x6   :  { %p110_p2 = pnand %p108_p1, %p105_p0 }
   0x8   :  { %113 = shalt.err (!%p110_p2)
}
   0x9   :  { %s114_s18 = scalar_lea.vmem %s16_s10, 256  ;;  %p119_p4 = scmp.lt.s32.totalorder %s16_s10, %s16_s10 }
   0xa   :  { %p115_p3 = scmp.ne.s32.totalorder %s16_s10, %s114_s18  ;;  %p120_p5 = scmp.lt.s32.totalorder %s114_s18, %s114_s18 }
   0xc   :  { %p121_p6 = por %p120_p5, %p119_p4 }
   0xe   :  { %p122_p7 = pnand %p121_p6, %p115_p3 }
  0x10   :  { %125 = shalt.err (!%p122_p7)
}
  0x11   :  { %s177_s19 = smov 128   ;;  %s178_s20 = smov 8  }
  0x12   :  { %21 = dma.hbm_to_vmem [thread:$0]  %s232_s0, 256, %s16_s10, [#allocation3], %s177_s19, %s177_s19, %s178_s20  }
  0x13   :  { %s179_s23 = smov [#allocation5]   ;;  %s126_s27 = scalar_lea.hbm %s233_s1, 256 }
  0x14   :  { %s27_s24 = sshll.u32 %s179_s23, 4  ;;  %p127_p8 = scmp.ne.s32.totalorder %s233_s1, %s126_s27  ;;  %s28_s24 = int_to_ptr.vmem [resolvable:$true] %s27_s24 }
  0x15   :  { %p130_p9 = scmp.lt.u32.totalorder %s126_s27, %s233_s1 }
  0x17   :  { %p132_p10 = pnand %p130_p9, %p127_p8 }
  0x19   :  { %135 = shalt.err (!%p132_p10)
}
  0x1a   :  { %s136_s4 = scalar_lea.vmem %s28_s24, 256  ;;  %p141_p12 = scmp.lt.s32.totalorder %s28_s24, %s28_s24 }
  0x1b   :  { %p137_p11 = scmp.ne.s32.totalorder %s28_s24, %s136_s4  ;;  %p142_p13 = scmp.lt.s32.totalorder %s136_s4, %s136_s4 }
  0x1d   :  { %p143_p0 = por %p142_p13, %p141_p12 }
  0x1f   :  { %p144_p1 = pnand %p143_p0, %p137_p11 }
  0x21   :  { %147 = shalt.err (!%p144_p1)
}
  0x22   :  { %33 = dma.hbm_to_vmem [thread:$0]  %s233_s1, 256, %s28_s24, [#allocation6], %s177_s19, %s177_s19, %s178_s20  }
  0x23   :  { %170 = dma.done.wait [#allocation3], 256  }
  0x24   :  { %171 = vsyncadd [#allocation3], 4294967040 }
  0x25   :  { %172 = dma.done.wait [#allocation6], 256  }
  0x26   :  { %173 = vsyncadd [#allocation6], 4294967040  ;;  %v40_v0 = vld [vmem:[#allocation2] sm:$0xff]  ;;  %v41_v1 = vld [vmem:[#allocation2 + $0x8] sm:$0xff]  ;;  %s180_s1 = smov [#allocation7]   ;;  %vm75_vm4 = vcmask 0  }
  0x27   :  { %v42_v2 = vld [vmem:[#allocation5] sm:$0xff]  ;;  %v43_v3 = vld [vmem:[#allocation5 + $0x8] sm:$0xff]  ;;  %s83_s6 = sshll.u32 %s180_s1, 4  ;;  %s84_s6 = int_to_ptr.vmem [resolvable:$true] %s83_s6 }
  0x28   :  { %v44_v4 = vsub.f32 %v40_v0, %v42_v2  ;;  %v45_v5 = vsub.f32 %v41_v1, %v43_v3  ;;  %s148_s8 = scalar_lea.vmem %s84_s6, 16  ;;  %s152_s9 = scalar_lea.vmem %s84_s6, 32 }
  0x29   :  { %p149_p2 = scmp.ne.s32.totalorder %s84_s6, %s148_s8  ;;  %p153_p3 = scmp.lt.s32.totalorder %s84_s6, %s84_s6 }
  0x2a   :  { %v46_v6 = vmul.f32 %v44_v4, %v44_v4  ;;  %v47_v7 = vmul.f32 %v45_v5, %v45_v5  ;;  %p154_p4 = scmp.lt.s32.totalorder %s152_s9, %s148_s8 }
  0x2c   :  { %v48_v8 = vadd.f32 1e-06, %v46_v6  ;;  %v49_v9 = vadd.f32 1e-06, %v47_v7  ;;  %p155_p5 = por %p154_p4, %p153_p3 }
  0x2e   :  { %100 = vrsqrt.f32 %v48_v8  ;;  %vm52_vm0 = vcmp.eq.f32.partialorder %v48_v8, inf  ;;  %v55_v11 = vand.u32 2147483648, %v48_v8  ;;  %vm54_vm1 = vcmp.eq.f32.partialorder %v48_v8, 0.0  ;;  %p156_p6 = pnand %p155_p5, %p149_p2 }
  0x2f   :  { %102 = vrsqrt.f32 %v49_v9  ;;  %vm59_vm2 = vcmp.eq.f32.partialorder %v49_v9, inf  ;;  %v62_v14 = vand.u32 2147483648, %v49_v9  ;;  %vm61_vm3 = vcmp.eq.f32.partialorder %v49_v9, 0.0 }
  0x38   :  { %v101_v10 = vpop.eup %100 }
  0x39   :  { %v103_v12 = vpop.eup %102  ;;  %v51_v13 = vmul.f32 %v101_v10, %v48_v8 }
  0x3a   :  { %v58_v15 = vmul.f32 %v103_v12, %v49_v9 }
  0x3b   :  { %v53_v16 = vsel %vm52_vm0, %v48_v8, %v51_v13 }
  0x3c   :  { %v56_v17 = vsel %vm54_vm1, %v55_v11, %v53_v16  ;;  %v60_v18 = vsel %vm59_vm2, %v49_v9, %v58_v15 }
  0x3d   :  { %v63_v19 = vsel %vm61_vm3, %v62_v14, %v60_v18 }
  0x3e   :  { %v64_v20 = vadd.f32 %v63_v19, %v56_v17 }
  0x40   :  { %65 = vadd.xlane.f32.xlu0 %v64_v20 }
  0xcd   :  { %v66_v21 = vpop.xlane.xlu0 %65 }
  0xce   :  { %v67_v22 = vrot.slane %v66_v21, 4 }
  0xd0   :  { %v68_v23 = vadd.f32 %v67_v22, %v66_v21 }
  0xd2   :  { %v69_v24 = vrot.slane %v68_v23, 2 }
  0xd4   :  { %v70_v25 = vadd.f32 %v69_v24, %v68_v23 }
  0xd6   :  { %v71_v26 = vrot.slane %v70_v25, 1 }
  0xd8   :  { %v72_v27 = vadd.f32 %v71_v26, %v70_v25 }
  0xda   :  { %93 = vpush %v72_v27 }
 0x10b   :  { %s94_s7 = spop %93 }
 0x10c   :  { %v74_v28 = vstv %s94_s7 }
 0x10d   :  { %76 = vst.msk [vmem:[#allocation7] sm:$0x1] %vm75_vm4, %v74_v28 }
 0x10e   :  { %159 = shalt.err (!%p156_p6)
}
 0x10f   :  { %s160_s12 = scalar_lea.hbm %s234_s2, 16 }
 0x110   :  { %p161_p7 = scmp.ne.s32.totalorder %s234_s2, %s160_s12  ;;  %p164_p8 = scmp.lt.u32.totalorder %s160_s12, %s234_s2 }
 0x112   :  { %p166_p9 = pnand %p164_p8, %p161_p7 }
 0x114   :  { %169 = shalt.err (!%p166_p9)
}
 0x115   :  { %86 = dma.vmem_to_hbm [thread:$0]  %s84_s6, 16, %s234_s2, [#allocation4]  }
 0x116   :  { %174 = dma.done.wait [#allocation4], 16  }
 0x117   :  { %175 = vsyncadd [#allocation4], 4294967280 }
 0x118   :  { %90 = vsyncpa [#allocation3], 1 }
 0x119   :  { %91 = vsyncpa [#allocation6], 1 }
 0x11a   :  { %92 = vsyncpa [#allocation4], 1 }

</bundles_post_ra>
